<compile_context>
chip_gen: v5e
topology: v5e:2x2
jax: 0.10.0
libtpu: 0.0.40
codegen_flags: <defaults>
</compile_context>

<pallas_src>
import jax
import jax.numpy as jnp
import numpy as np
from jax.experimental import pallas as pl
from jax.experimental.pallas import tpu as pltpu


def _round_up(v, m):
    return (v + m - 1) // m * m


# ----------------------------- Pallas kernel --------------------------------

def _make_decode_convblock_kernel(H, W):
    """Fused (conv3x3 -> BN -> ReLU) x 2 for one batch element.

    In-kernel layout: channels on sublanes, flattened H*W on the 128-lane axis.
    Each conv is one im2col MXU matmul with f32 accumulation; SAME zero padding
    is realized with a lane-aligned zero guard band plus column-edge masks, so
    neither a padded image nor the intermediate activation ever touches HBM.
    """
    P = H * W
    OFF = _round_up(W + 1, 128)   # lane-aligned zero guard, covers the +-1 row shifts

    def _im2col(img, not_left, not_right):
        # img: (C, P) value, C a multiple of 8.  Returns (9*C, P) with rows
        # ordered (kh, kw, c) -- matches w.transpose(0,2,3,1).reshape(Co, 9*C).
        C = img.shape[0]
        guard = jnp.zeros((C, OFF), jnp.float32)
        # Aligned lane-axis concat (every piece is a multiple of 128 lanes here).
        buf = jnp.concatenate([guard, img, guard], axis=1)     # (C, OFF + P + OFF)
        slabs = []
        for kh in range(3):
            for kw in range(3):
                start = OFF + (kh - 1) * W + (kw - 1)
                slab = buf[:, start:start + P]                 # static lane slice
                if kw == 0:
                    slab = jnp.where(not_left, slab, 0.0)      # mask wrapped w-1
                elif kw == 2:
                    slab = jnp.where(not_right, slab, 0.0)     # mask wrapped w+1
                slabs.append(slab)
        # 9 slabs of C (multiple of 8) rows -> aligned sublane concat.
        return jnp.concatenate(slabs, axis=0)                  # (9*C, P)

    def kernel(x_ref, w1_ref, b1_ref, w2_ref, b2_ref, o_ref):
        # Column-edge masks, computed once per grid step.
        ww = jax.lax.broadcasted_iota(jnp.int32, (1, P), 1) % W
        not_left = ww >= 1
        not_right = ww <= W - 2

        img = x_ref[0]                                          # (Cin_p, P)

        # conv1 + BN(folded) + ReLU -- single K=9*Cin_p matmul on the MXU.
        cols1 = _im2col(img, not_left, not_right)               # (9*Cin_p, P)
        h1 = jnp.dot(w1_ref[...], cols1,
                     preferred_element_type=jnp.float32)        # (Cmid_p, P)
        h1 = jnp.maximum(h1 + b1_ref[...], 0.0)

        # conv2 + BN(folded) + ReLU -- intermediate h1 never leaves the core.
        cols2 = _im2col(h1, not_left, not_right)                # (9*Cmid_p, P)
        h2 = jnp.dot(w2_ref[...], cols2,
                     preferred_element_type=jnp.float32)        # (Cout, P)
        o_ref[0, :, :] = jnp.maximum(h2 + b2_ref[...], 0.0)     # lane-dense store

    return kernel


def _conv_block_fused(x_all, w1m, b1, w2m, b2, H, W):
    """pallas_call wrapper: grid over batch, whole (C, H*W) image per step."""
    N, Cin_p, P = x_all.shape
    Cout = w2m.shape[0]
    kernel = _make_decode_convblock_kernel(H, W)
    # NOTE: at realistic decoder resolutions, tile H into the grid (halo
    # index_map) and/or batch several images per step; at 16x16 one whole image
    # per step is optimal and the batch axis shards across v7x TensorCores.
    return pl.pallas_call(
        kernel,
        out_shape=jax.ShapeDtypeStruct((N, Cout, P), jnp.float32),
        grid_spec=pltpu.PrefetchScalarGridSpec(
            num_scalar_prefetch=0,
            grid=(N,),
            in_specs=[
                pl.BlockSpec((1, Cin_p, P), lambda n: (n, 0, 0)),
                pl.BlockSpec(w1m.shape, lambda n: (0, 0)),
                pl.BlockSpec(b1.shape, lambda n: (0, 0)),
                pl.BlockSpec(w2m.shape, lambda n: (0, 0)),
                pl.BlockSpec(b2.shape, lambda n: (0, 0)),
            ],
            out_specs=pl.BlockSpec((1, Cout, P), lambda n: (n, 0, 0)),
        ),
        compiler_params=pltpu.CompilerParams(
            dimension_semantics=("parallel",)),
    )(x_all, w1m, b1, w2m, b2)


# ------------------------------ host-side prep --------------------------------

def _fold_conv_bn(w_oihw, gamma, beta, mean, var, cin_pad, cout_pad, eps=1e-5):
    """Fold eval-mode BatchNorm into the conv weights and a bias.

    Returns (wm, b): wm is (cout_pad, 9*cin_pad) with columns ordered
    (kh, kw, cin) to match the kernel's im2col rows; b is (cout_pad, 1).
    Padded rows/columns are zero, so padded channels stay exactly zero.
    """
    w = w_oihw.astype(jnp.float32)                 # (Cout, Cin, 3, 3)  OIHW
    cout, cin, kh, kw = w.shape
    scale = gamma.astype(jnp.float32) / jnp.sqrt(var.astype(jnp.float32) + eps)
    shift = beta.astype(jnp.float32) - mean.astype(jnp.float32) * scale
    w = w * scale[:, None, None, None]             # fold BN scale into weights
    w = jnp.pad(w, ((0, cout_pad - cout), (0, cin_pad - cin), (0, 0), (0, 0)))
    wm = jnp.transpose(w, (0, 2, 3, 1)).reshape(cout_pad, kh * kw * cin_pad)
    b = jnp.pad(shift, (0, cout_pad - cout)).reshape(cout_pad, 1)
    return wm, b


def _bilinear_upsample_2x_align_corners(x_nchw):
    """nn.Upsample(scale_factor=2, mode='bilinear', align_corners=True), NCHW."""
    N, C, H, W = x_nchw.shape
    Ho, Wo = 2 * H, 2 * W

    def src(out_size, in_size):
        if out_size == 1:
            return jnp.zeros((out_size,), jnp.float32)
        return jnp.arange(out_size, dtype=jnp.float32) * (in_size - 1) / (out_size - 1)

    sy, sx = src(Ho, H), src(Wo, W)
    y0 = jnp.floor(sy).astype(jnp.int32)
    y1 = jnp.minimum(y0 + 1, H - 1)
    x0 = jnp.floor(sx).astype(jnp.int32)
    x1 = jnp.minimum(x0 + 1, W - 1)
    wy = (sy - y0.astype(jnp.float32))[None, None, :, None]
    wx = (sx - x0.astype(jnp.float32))[None, None, None, :]
    top, bot = x_nchw[:, :, y0, :], x_nchw[:, :, y1, :]
    v = top * (1.0 - wy) + bot * wy
    left, right = v[:, :, :, x0], v[:, :, :, x1]
    return left * (1.0 - wx) + right * wx


def decode_up_forward(x_nchw, y_nchw, params):
    """DecodeUp.forward.  Inputs/outputs in NCHW (PyTorch layout)."""
    x = x_nchw.astype(jnp.float32)
    y = y_nchw.astype(jnp.float32)

    # 1) bilinear 2x upsample (align_corners=True) -- cheap JAX gather glue.
    x = _bilinear_upsample_2x_align_corners(x)

    # 2) faithful reproduction of the module's pad-factor computation, which
    #    uses NCHW dims 1 (=C) and 2 (=H); F.pad([wl,wr,ht,hb]) pads W then H.
    HFactor = abs(y.shape[1] - x.shape[1])
    WFactor = abs(y.shape[2] - x.shape[2])
    x = jnp.pad(x, ((0, 0), (0, 0),
                    (HFactor // 2, HFactor - HFactor // 2),
                    (WFactor // 2, WFactor - WFactor // 2)))

    N, Cy, H, W = y.shape
    Cx = x.shape[1]
    if x.shape[2:] != (H, W):
        raise ValueError("skip connection and upsampled input spatial dims differ")
    P = H * W
    Cin = Cy + Cx
    Cin_p = _round_up(Cin, 8)      # sublane-align the concatenated channel count

    # 3) channel concat (y first), flattened to (N, C, H*W) so the kernel's
    #    128-lane axis is dense; zero channels keep im2col slabs tile-aligned.
    pieces = [y.reshape(N, Cy, P), x.reshape(N, Cx, P)]
    if Cin_p > Cin:
        pieces.append(jnp.zeros((N, Cin_p - Cin, P), jnp.float32))
    x_all = jnp.concatenate(pieces, axis=1)

    # 4) ConvBlock(in, out, mid=in//2): both conv+BN+ReLU stages fused into a
    #    single Pallas kernel; BN (eval mode) folded into weights + bias.
    w1, w2 = params["w1"], params["w2"]
    Cmid, Cout = w1.shape[0], w2.shape[0]
    Cmid_p = _round_up(Cmid, 8)    # pad conv1 outputs -> aligned conv2 im2col

    w1m, b1 = _fold_conv_bn(w1, params["bn1_gamma"], params["bn1_beta"],
                            params["bn1_mean"], params["bn1_var"],
                            cin_pad=Cin_p, cout_pad=Cmid_p)
    w2m, b2 = _fold_conv_bn(w2, params["bn2_gamma"], params["bn2_beta"],
                            params["bn2_mean"], params["bn2_var"],
                            cin_pad=Cmid_p, cout_pad=Cout)

    out_flat = _conv_block_fused(x_all, w1m, b1, w2m, b2, H, W)
    return out_flat.reshape(N, Cout, H, W)


# --------------------------- pure-JAX reference -------------------------------

def _ref_conv_bn_relu(x, w_oihw, gamma, beta, mean, var, eps=1e-5):
    scale = gamma / jnp.sqrt(var + eps)
    shift = beta - mean * scale
    out = jax.lax.conv_general_dilated(
        x, w_oihw, window_strides=(1, 1), padding="SAME",
        dimension_numbers=("NCHW", "OIHW", "NCHW"),
        precision=jax.lax.Precision.HIGHEST)
    out = out * scale[None, :, None, None] + shift[None, :, None, None]
    return jnp.maximum(out, 0.0)


def decode_up_reference(x_nchw, y_nchw, params):
    x = x_nchw.astype(jnp.float32)
    y = y_nchw.astype(jnp.float32)
    x = _bilinear_upsample_2x_align_corners(x)
    HFactor = abs(y.shape[1] - x.shape[1])
    WFactor = abs(y.shape[2] - x.shape[2])
    x = jnp.pad(x, ((0, 0), (0, 0),
                    (HFactor // 2, HFactor - HFactor // 2),
                    (WFactor // 2, WFactor - WFactor // 2)))
    x = jnp.concatenate([y, x], axis=1)
    x = _ref_conv_bn_relu(x, params["w1"], params["bn1_gamma"], params["bn1_beta"],
                          params["bn1_mean"], params["bn1_var"])
    x = _ref_conv_bn_relu(x, params["w2"], params["bn2_gamma"], params["bn2_beta"],
                          params["bn2_mean"], params["bn2_var"])
    return x


# --------------------------------- main ---------------------------------------

if __name__ == "__main__":
    # DecodeUp(in_channel=8, out_channel=4): mid = in_channel // 2 = 4
    in_channel, out_channel = 8, 4
    mid_channel = in_channel // 2

    key = jax.random.PRNGKey(0)
    kx, ky, kw1, kw2, kg1, kb1, km1, kv1, kg2, kb2, km2, kv2 = jax.random.split(key, 12)

    # x: deep feature (N, C=4, 8, 8);  y: skip connection (N, C=4, 16, 16)  [NCHW]
    x_nchw = jax.random.normal(kx, (2, 4, 8, 8), dtype=jnp.float32)
    y_nchw = jax.random.normal(ky, (2, 4, 16, 16), dtype=jnp.float32)

    params = {
        # conv weights in PyTorch OIHW layout
        "w1": jax.random.normal(kw1, (mid_channel, in_channel, 3, 3), jnp.float32) * 0.1,
        "w2": jax.random.normal(kw2, (out_channel, mid_channel, 3, 3), jnp.float32) * 0.1,
        # BatchNorm (inference-mode running stats + affine), deterministic
        "bn1_gamma": 0.5 + jax.random.uniform(kg1, (mid_channel,), jnp.float32),
        "bn1_beta":  0.1 * jax.random.normal(kb1, (mid_channel,), jnp.float32),
        "bn1_mean":  0.1 * jax.random.normal(km1, (mid_channel,), jnp.float32),
        "bn1_var":   0.5 + jax.random.uniform(kv1, (mid_channel,), jnp.float32),
        "bn2_gamma": 0.5 + jax.random.uniform(kg2, (out_channel,), jnp.float32),
        "bn2_beta":  0.1 * jax.random.normal(kb2, (out_channel,), jnp.float32),
        "bn2_mean":  0.1 * jax.random.normal(km2, (out_channel,), jnp.float32),
        "bn2_var":   0.5 + jax.random.uniform(kv2, (out_channel,), jnp.float32),
    }

    out = jax.jit(decode_up_forward)(x_nchw, y_nchw, params)
    out = jax.block_until_ready(out)

    ref = jax.block_until_ready(decode_up_reference(x_nchw, y_nchw, params))
    assert out.shape == (2, out_channel, 16, 16), out.shape
    np.testing.assert_allclose(np.asarray(out), np.asarray(ref), atol=1e-3, rtol=1e-3)

    print("KERNEL_OK")
</pallas_src>

<mosaic_0001>
module attributes {stable_mosaic.version = 11 : i64} {
  func.func @kernel(%arg0: i32, %arg1: memref<1x8x256xf32, #tpu.memory_space<vmem>>, %arg2: memref<8x72xf32, #tpu.memory_space<vmem>>, %arg3: memref<8x1xf32, #tpu.memory_space<vmem>>, %arg4: memref<4x72xf32, #tpu.memory_space<vmem>>, %arg5: memref<4x1xf32, #tpu.memory_space<vmem>>, %arg6: memref<1x4x256xf32, #tpu.memory_space<vmem>>) attributes {dimension_semantics = [#tpu.dimension_semantics<parallel>], iteration_bounds = array<i64: 2>, scalar_prefetch = 0 : i64, scratch_operands = 0 : i64, tpu.core_type = #tpu.core_type<tc>, window_params = [{transform_indices = @transform_0, window_bounds = array<i64: 1, 8, 256>}, {pipeline_mode = #tpu.pipeline_mode<synchronous>, transform_indices = @transform_1, window_bounds = array<i64: 8, 72>}, {pipeline_mode = #tpu.pipeline_mode<synchronous>, transform_indices = @transform_2, window_bounds = array<i64: 8, 1>}, {pipeline_mode = #tpu.pipeline_mode<synchronous>, transform_indices = @transform_3, window_bounds = array<i64: 4, 72>}, {pipeline_mode = #tpu.pipeline_mode<synchronous>, transform_indices = @transform_4, window_bounds = array<i64: 4, 1>}, {transform_indices = @transform_5, window_bounds = array<i64: 1, 4, 256>}]} {
    %0 = tpu.iota {dimensions = array<i32: 1>} : vector<1x256xi32>
    %c16_i32 = arith.constant 16 : i32
    %c0_i32 = arith.constant 0 : i32
    %1 = arith.cmpi eq, %c16_i32, %c0_i32 : i32
    %c1_i32 = arith.constant 1 : i32
    %2 = arith.select %1, %c1_i32, %c16_i32 : i32
    %3 = vector.broadcast %2 : i32 to vector<1x256xi32>
    %4 = arith.remsi %0, %3 : vector<1x256xi32>
    %c0_i32_0 = arith.constant 0 : i32
    %5 = vector.broadcast %c0_i32_0 : i32 to vector<1x256xi32>
    %6 = arith.cmpi ne, %4, %5 : vector<1x256xi32>
    %c0_i32_1 = arith.constant 0 : i32
    %7 = vector.broadcast %c0_i32_1 : i32 to vector<1x256xi32>
    %8 = arith.cmpi slt, %4, %7 : vector<1x256xi32>
    %c0_i32_2 = arith.constant 0 : i32
    %9 = arith.cmpi slt, %2, %c0_i32_2 : i32
    %10 = vector.broadcast %9 : i1 to vector<1x256xi1>
    %11 = vector.broadcast %10 : vector<1x256xi1> to vector<1x256xi1>
    %12 = arith.xori %8, %11 : vector<1x256xi1>
    %13 = arith.andi %12, %6 : vector<1x256xi1>
    %14 = vector.broadcast %2 : i32 to vector<1x256xi32>
    %15 = arith.addi %4, %14 : vector<1x256xi32>
    %16 = arith.select %13, %15, %4 : vector<1x256xi1>, vector<1x256xi32>
    %c1_i32_3 = arith.constant 1 : i32
    %17 = vector.broadcast %c1_i32_3 : i32 to vector<1x256xi32>
    %18 = arith.cmpi sge, %16, %17 : vector<1x256xi32>
    %c14_i32 = arith.constant 14 : i32
    %19 = vector.broadcast %c14_i32 : i32 to vector<1x256xi32>
    %20 = arith.cmpi sle, %16, %19 : vector<1x256xi32>
    %c0 = arith.constant 0 : index
    %c0_4 = arith.constant 0 : index
    %c0_5 = arith.constant 0 : index
    %21 = vector.load %arg1[%c0, %c0_4, %c0_5] : memref<1x8x256xf32, #tpu.memory_space<vmem>>, vector<1x8x256xf32>
    %22 = vector.shape_cast %21 : vector<1x8x256xf32> to vector<8x256xf32>
    %cst = arith.constant 0.000000e+00 : f32
    %23 = vector.broadcast %cst : f32 to vector<8x128xf32>
    %24 = tpu.concatenate %23, %22, %23 in 1 : vector<8x128xf32>, vector<8x256xf32>, vector<8x128xf32> -> vector<8x512xf32>
    %25 = vector.extract_strided_slice %24 {offsets = [0, 111], sizes = [8, 256], strides = [1, 1]} : vector<8x512xf32> to vector<8x256xf32>
    %cst_6 = arith.constant 0.000000e+00 : f32
    %26 = vector.shape_cast %18 : vector<1x256xi1> to vector<1x256xi1>
    %27 = vector.broadcast %26 : vector<1x256xi1> to vector<8x256xi1>
    %28 = vector.broadcast %cst_6 : f32 to vector<8x256xf32>
    %29 = arith.select %27, %25, %28 : vector<8x256xi1>, vector<8x256xf32>
    %30 = vector.extract_strided_slice %24 {offsets = [0, 112], sizes = [8, 256], strides = [1, 1]} : vector<8x512xf32> to vector<8x256xf32>
    %31 = vector.extract_strided_slice %24 {offsets = [0, 113], sizes = [8, 256], strides = [1, 1]} : vector<8x512xf32> to vector<8x256xf32>
    %cst_7 = arith.constant 0.000000e+00 : f32
    %32 = vector.shape_cast %20 : vector<1x256xi1> to vector<1x256xi1>
    %33 = vector.broadcast %32 : vector<1x256xi1> to vector<8x256xi1>
    %34 = vector.broadcast %cst_7 : f32 to vector<8x256xf32>
    %35 = arith.select %33, %31, %34 : vector<8x256xi1>, vector<8x256xf32>
    %36 = vector.extract_strided_slice %24 {offsets = [0, 127], sizes = [8, 256], strides = [1, 1]} : vector<8x512xf32> to vector<8x256xf32>
    %cst_8 = arith.constant 0.000000e+00 : f32
    %37 = vector.shape_cast %18 : vector<1x256xi1> to vector<1x256xi1>
    %38 = vector.broadcast %37 : vector<1x256xi1> to vector<8x256xi1>
    %39 = vector.broadcast %cst_8 : f32 to vector<8x256xf32>
    %40 = arith.select %38, %36, %39 : vector<8x256xi1>, vector<8x256xf32>
    %41 = vector.extract_strided_slice %24 {offsets = [0, 128], sizes = [8, 256], strides = [1, 1]} : vector<8x512xf32> to vector<8x256xf32>
    %42 = vector.extract_strided_slice %24 {offsets = [0, 129], sizes = [8, 256], strides = [1, 1]} : vector<8x512xf32> to vector<8x256xf32>
    %cst_9 = arith.constant 0.000000e+00 : f32
    %43 = vector.shape_cast %20 : vector<1x256xi1> to vector<1x256xi1>
    %44 = vector.broadcast %43 : vector<1x256xi1> to vector<8x256xi1>
    %45 = vector.broadcast %cst_9 : f32 to vector<8x256xf32>
    %46 = arith.select %44, %42, %45 : vector<8x256xi1>, vector<8x256xf32>
    %47 = vector.extract_strided_slice %24 {offsets = [0, 143], sizes = [8, 256], strides = [1, 1]} : vector<8x512xf32> to vector<8x256xf32>
    %cst_10 = arith.constant 0.000000e+00 : f32
    %48 = vector.shape_cast %18 : vector<1x256xi1> to vector<1x256xi1>
    %49 = vector.broadcast %48 : vector<1x256xi1> to vector<8x256xi1>
    %50 = vector.broadcast %cst_10 : f32 to vector<8x256xf32>
    %51 = arith.select %49, %47, %50 : vector<8x256xi1>, vector<8x256xf32>
    %52 = vector.extract_strided_slice %24 {offsets = [0, 144], sizes = [8, 256], strides = [1, 1]} : vector<8x512xf32> to vector<8x256xf32>
    %53 = vector.extract_strided_slice %24 {offsets = [0, 145], sizes = [8, 256], strides = [1, 1]} : vector<8x512xf32> to vector<8x256xf32>
    %cst_11 = arith.constant 0.000000e+00 : f32
    %54 = vector.shape_cast %20 : vector<1x256xi1> to vector<1x256xi1>
    %55 = vector.broadcast %54 : vector<1x256xi1> to vector<8x256xi1>
    %56 = vector.broadcast %cst_11 : f32 to vector<8x256xf32>
    %57 = arith.select %55, %53, %56 : vector<8x256xi1>, vector<8x256xf32>
    %58 = tpu.concatenate %29, %30, %35, %40, %41, %46, %51, %52, %57 in 0 : vector<8x256xf32>, vector<8x256xf32>, vector<8x256xf32>, vector<8x256xf32>, vector<8x256xf32>, vector<8x256xf32>, vector<8x256xf32>, vector<8x256xf32>, vector<8x256xf32> -> vector<72x256xf32>
    %c0_12 = arith.constant 0 : index
    %c0_13 = arith.constant 0 : index
    %59 = vector.load %arg2[%c0_12, %c0_13] : memref<8x72xf32, #tpu.memory_space<vmem>>, vector<8x72xf32>
    %cst_14 = arith.constant dense<0.000000e+00> : vector<8x256xf32>
    %60 = tpu.matmul %59, %58, %cst_14 {dimension_numbers = #tpu.dot_dimension_numbers<[1], [0], [0], [1], [0, 0, 1, 1], [], []>} : vector<8x72xf32>, vector<72x256xf32>, vector<8x256xf32> -> vector<8x256xf32>
    %c0_15 = arith.constant 0 : index
    %c0_16 = arith.constant 0 : index
    %61 = vector.load %arg3[%c0_15, %c0_16] : memref<8x1xf32, #tpu.memory_space<vmem>>, vector<8x1xf32>
    %62 = vector.broadcast %61 : vector<8x1xf32> to vector<8x256xf32>
    %63 = arith.addf %60, %62 : vector<8x256xf32>
    %cst_17 = arith.constant 0.000000e+00 : f32
    %64 = vector.broadcast %cst_17 : f32 to vector<8x256xf32>
    %65 = arith.maximumf %63, %64 : vector<8x256xf32>
    %cst_18 = arith.constant 0.000000e+00 : f32
    %66 = vector.broadcast %cst_18 : f32 to vector<8x128xf32>
    %67 = tpu.concatenate %66, %65, %66 in 1 : vector<8x128xf32>, vector<8x256xf32>, vector<8x128xf32> -> vector<8x512xf32>
    %68 = vector.extract_strided_slice %67 {offsets = [0, 111], sizes = [8, 256], strides = [1, 1]} : vector<8x512xf32> to vector<8x256xf32>
    %cst_19 = arith.constant 0.000000e+00 : f32
    %69 = vector.shape_cast %18 : vector<1x256xi1> to vector<1x256xi1>
    %70 = vector.broadcast %69 : vector<1x256xi1> to vector<8x256xi1>
    %71 = vector.broadcast %cst_19 : f32 to vector<8x256xf32>
    %72 = arith.select %70, %68, %71 : vector<8x256xi1>, vector<8x256xf32>
    %73 = vector.extract_strided_slice %67 {offsets = [0, 112], sizes = [8, 256], strides = [1, 1]} : vector<8x512xf32> to vector<8x256xf32>
    %74 = vector.extract_strided_slice %67 {offsets = [0, 113], sizes = [8, 256], strides = [1, 1]} : vector<8x512xf32> to vector<8x256xf32>
    %cst_20 = arith.constant 0.000000e+00 : f32
    %75 = vector.shape_cast %20 : vector<1x256xi1> to vector<1x256xi1>
    %76 = vector.broadcast %75 : vector<1x256xi1> to vector<8x256xi1>
    %77 = vector.broadcast %cst_20 : f32 to vector<8x256xf32>
    %78 = arith.select %76, %74, %77 : vector<8x256xi1>, vector<8x256xf32>
    %79 = vector.extract_strided_slice %67 {offsets = [0, 127], sizes = [8, 256], strides = [1, 1]} : vector<8x512xf32> to vector<8x256xf32>
    %cst_21 = arith.constant 0.000000e+00 : f32
    %80 = vector.shape_cast %18 : vector<1x256xi1> to vector<1x256xi1>
    %81 = vector.broadcast %80 : vector<1x256xi1> to vector<8x256xi1>
    %82 = vector.broadcast %cst_21 : f32 to vector<8x256xf32>
    %83 = arith.select %81, %79, %82 : vector<8x256xi1>, vector<8x256xf32>
    %84 = vector.extract_strided_slice %67 {offsets = [0, 128], sizes = [8, 256], strides = [1, 1]} : vector<8x512xf32> to vector<8x256xf32>
    %85 = vector.extract_strided_slice %67 {offsets = [0, 129], sizes = [8, 256], strides = [1, 1]} : vector<8x512xf32> to vector<8x256xf32>
    %cst_22 = arith.constant 0.000000e+00 : f32
    %86 = vector.shape_cast %20 : vector<1x256xi1> to vector<1x256xi1>
    %87 = vector.broadcast %86 : vector<1x256xi1> to vector<8x256xi1>
    %88 = vector.broadcast %cst_22 : f32 to vector<8x256xf32>
    %89 = arith.select %87, %85, %88 : vector<8x256xi1>, vector<8x256xf32>
    %90 = vector.extract_strided_slice %67 {offsets = [0, 143], sizes = [8, 256], strides = [1, 1]} : vector<8x512xf32> to vector<8x256xf32>
    %cst_23 = arith.constant 0.000000e+00 : f32
    %91 = vector.shape_cast %18 : vector<1x256xi1> to vector<1x256xi1>
    %92 = vector.broadcast %91 : vector<1x256xi1> to vector<8x256xi1>
    %93 = vector.broadcast %cst_23 : f32 to vector<8x256xf32>
    %94 = arith.select %92, %90, %93 : vector<8x256xi1>, vector<8x256xf32>
    %95 = vector.extract_strided_slice %67 {offsets = [0, 144], sizes = [8, 256], strides = [1, 1]} : vector<8x512xf32> to vector<8x256xf32>
    %96 = vector.extract_strided_slice %67 {offsets = [0, 145], sizes = [8, 256], strides = [1, 1]} : vector<8x512xf32> to vector<8x256xf32>
    %cst_24 = arith.constant 0.000000e+00 : f32
    %97 = vector.shape_cast %20 : vector<1x256xi1> to vector<1x256xi1>
    %98 = vector.broadcast %97 : vector<1x256xi1> to vector<8x256xi1>
    %99 = vector.broadcast %cst_24 : f32 to vector<8x256xf32>
    %100 = arith.select %98, %96, %99 : vector<8x256xi1>, vector<8x256xf32>
    %101 = tpu.concatenate %72, %73, %78, %83, %84, %89, %94, %95, %100 in 0 : vector<8x256xf32>, vector<8x256xf32>, vector<8x256xf32>, vector<8x256xf32>, vector<8x256xf32>, vector<8x256xf32>, vector<8x256xf32>, vector<8x256xf32>, vector<8x256xf32> -> vector<72x256xf32>
    %c0_25 = arith.constant 0 : index
    %c0_26 = arith.constant 0 : index
    %102 = vector.load %arg4[%c0_25, %c0_26] : memref<4x72xf32, #tpu.memory_space<vmem>>, vector<4x72xf32>
    %cst_27 = arith.constant dense<0.000000e+00> : vector<4x256xf32>
    %103 = tpu.matmul %102, %101, %cst_27 {dimension_numbers = #tpu.dot_dimension_numbers<[1], [0], [0], [1], [0, 0, 1, 1], [], []>} : vector<4x72xf32>, vector<72x256xf32>, vector<4x256xf32> -> vector<4x256xf32>
    %c0_28 = arith.constant 0 : index
    %c0_29 = arith.constant 0 : index
    %104 = vector.load %arg5[%c0_28, %c0_29] : memref<4x1xf32, #tpu.memory_space<vmem>>, vector<4x1xf32>
    %105 = vector.broadcast %104 : vector<4x1xf32> to vector<4x256xf32>
    %106 = arith.addf %103, %105 : vector<4x256xf32>
    %cst_30 = arith.constant 0.000000e+00 : f32
    %107 = vector.broadcast %cst_30 : f32 to vector<4x256xf32>
    %108 = arith.maximumf %106, %107 : vector<4x256xf32>
    %c0_31 = arith.constant 0 : index
    %c0_32 = arith.constant 0 : index
    %c0_33 = arith.constant 0 : index
    %109 = vector.load %arg6[%c0_31, %c0_32, %c0_33] : memref<1x4x256xf32, #tpu.memory_space<vmem>>, vector<1x4x256xf32>
    %110 = vector.shape_cast %109 : vector<1x4x256xf32> to vector<4x256xf32>
    %111 = vector.shape_cast %108 : vector<4x256xf32> to vector<1x4x256xf32>
    tpu.vector_store %arg6[%c0_31, %c0_32, %c0_33], %111 {strides = array<i32>} : memref<1x4x256xf32, #tpu.memory_space<vmem>>, vector<1x4x256xf32>,
    return
  }
  func.func @transform_0(%arg0: i32) -> (i32, i32, i32) {
    %c0_i32 = arith.constant 0 : i32
    %c0_i32_0 = arith.constant 0 : i32
    %c0_i32_1 = arith.constant 0 : i32
    return %arg0, %c0_i32, %c0_i32_0 : i32, i32, i32
  }
  func.func @transform_1(%arg0: i32) -> (i32, i32) {
    %c0_i32 = arith.constant 0 : i32
    %c0_i32_0 = arith.constant 0 : i32
    %c0_i32_1 = arith.constant 0 : i32
    return %c0_i32, %c0_i32_0 : i32, i32
  }
  func.func @transform_2(%arg0: i32) -> (i32, i32) {
    %c0_i32 = arith.constant 0 : i32
    %c0_i32_0 = arith.constant 0 : i32
    %c0_i32_1 = arith.constant 0 : i32
    return %c0_i32, %c0_i32_0 : i32, i32
  }
  func.func @transform_3(%arg0: i32) -> (i32, i32) {
    %c0_i32 = arith.constant 0 : i32
    %c0_i32_0 = arith.constant 0 : i32
    %c0_i32_1 = arith.constant 0 : i32
    return %c0_i32, %c0_i32_0 : i32, i32
  }
  func.func @transform_4(%arg0: i32) -> (i32, i32) {
    %c0_i32 = arith.constant 0 : i32
    %c0_i32_0 = arith.constant 0 : i32
    %c0_i32_1 = arith.constant 0 : i32
    return %c0_i32, %c0_i32_0 : i32, i32
  }
  func.func @transform_5(%arg0: i32) -> (i32, i32, i32) {
    %c0_i32 = arith.constant 0 : i32
    %c0_i32_0 = arith.constant 0 : i32
    %c0_i32_1 = arith.constant 0 : i32
    return %arg0, %c0_i32, %c0_i32_0 : i32, i32, i32
  }
}

</mosaic_0001>

<bundles_post_ra>
// kernel: decode_up_forward.1
= control target key start
LH: loop header
LB: loop body
LE: loop exit
PB: predicated region body
PF: predicated region fallthrough
CT: control target
= control target key end

     0   :  { %s743_s18 = smov 0   ;;  %s970_s0 = inlined_call_operand.vmem [shape: f32[2,8,256], index: 0, kind: input, shape index: {}]   ;;  %s971_s1 = inlined_call_operand.vmem [shape: f32[8,72], index: 1, kind: input, shape index: {}]   ;;  %s972_s2 = inlined_call_operand.vmem [shape: f32[8,1], index: 2, kind: input, shape index: {}]   ;;  %s973_s3 = inlined_call_operand.vmem [shape: f32[4,72], index: 3, kind: input, shape index: {}]   ;;  %s974_s4 = inlined_call_operand.vmem [shape: f32[4,1], index: 4, kind: input, shape index: {}]   ;;  %s975_s5 = inlined_call_operand.vmem [shape: f32[2,4,256], index: 5, kind: output, shape index: {}]  }
   0x1 LB: > { %s614_s19 = sadd.s32 4294967295, %s701_s18   ;;  %p618_p0 = scmp.ge.s32.totalorder %s701_s18, 1  ;;  %s701_s18 = sphi %s743_s18, %s15_s18  }
   0x2   : > { %p187_p1 = scmp.lt.s32.totalorder %s701_s18, 3 }
   0x4   : > { %p188_p2 = pnand %p618_p0, %p187_p1 }
   0x5   : > { %p215_p3 = scmp.lt.s32.totalorder (!%p188_p2), %s614_s19, 1  ;;  %s703_s24 = smov (!%p188_p2), 111  }
   0x6   : > { %191 = sbr.rel (%p188_p2) target bundleno = 607 (0x25f), region = 40  ;;  %s704_s25 = smov (!%p188_p2), 113  }
   0x7   : > { %s706_s26 = smov (!%p188_p2), 112   ;;  %s707_s27 = smov (!%p188_p2), 127  }
   0x8   : > { %s708_s28 = smov (!%p188_p2), 1   ;;  %s709_s29 = smov (!%p188_p2), 15  }
   0x9   : > { %s710_s30 = smov (!%p188_p2), 16   ;;  %s711_s6 = smov (!%p188_p2), 17  }
   0xb   : > { %s985_s19 = smov (!%p215_p3, %s614_s19), 1  ;;  %v705_v3 = vmov 0.0   ;;  %v225_v6 = vlaneseq  ;;  %vm340_vm0 = vcmask 908288   ;;  %vm364_vm3 = vcmask 916480   ;;  %v370_v37 = vld [vmem:[%s972_s2] sm:$0xff] }
   0xc   : > { %s653_s20 = sshll.u32 %s985_s19, 4  ;;  %vm327_vm4 = vcmask 924672   ;;  %vm314_vm6 = vcmask 1039360   ;;  %v712_v38 = vmov 0   ;;  %vm301_vm8 = vcmask 7168   ;;  %v369_v55 = vld [vmem:[%s971_s1] sm:$0xff] }
   0xd   : > { %s219_s23 = scalar_lea.vmem %s970_s0, %s653_s20  ;;  %v226_v7 = vand.u32 127, %v225_v6  ;;  %683 = vset.pattern.permute.xlu1 %v712_v38  ;;  %694 = vset.pattern.permute.xlu0 %v712_v38  ;;  %vm288_vm9 = vcmask 121856   ;;  %vm353_vm10 = vcmask 130048   ;;  %vm271_vm11 = vcmask 138240   ;;  %v500_v10 = vld [vmem:[%s973_s3] sm:$0xf] }
   0xe   : > { %v757_v0 = vld [vmem:[%s219_s23 + $0x8] sm:$0xff]  ;;  %v759_v1 = vld [vmem:[%s219_s23] sm:$0xff]  ;;  %vm376_vm12 = vcmask 588800   ;;  %s654_s15 = sshll.u32 %s985_s19, 3  ;;  %vm555_vm13 = vcmask 1043456  }
   0xf   : > { %336 = vrot.lane.b32.xlu0 %v757_v0, %s703_s24  ;;  %334 = vrot.lane.b32.xlu1 %v759_v1, %s703_s24  ;;  %v673_v2 = vpack.i.bf16 0.0, %v757_v0  ;;  %v678_v4 = vpack.i.bf16 %v757_v0, %v759_v1  ;;  %v232_v9 = vand.u32 15, %v226_v7  ;;  %v227_v11 = vadd.s32 128, %v226_v7  ;;  %s224_s20 = scalar_lea.vmem %s975_s5, %s654_s15 }
  0x10   : > { %323 = vrot.lane.b32.xlu2 %v757_v0, %s704_s25 }
  0x11   : > { %vm801_vm1 = vcmp.le.s32.totalorder %v232_v9, 14  ;;  %v239_v16 = vand.u32 15, %v227_v11  ;;  %vm841_vm7 = vcmp.ge.s32.totalorder %v232_v9, 1 }
  0x13   : > { %vm810_vm2 = vcmp.le.s32.totalorder %v239_v16, 14  ;;  %vm827_vm5 = vcmp.ge.s32.totalorder %v239_v16, 1 }
  0x17   : > { %338 = vrot.lane.b32.xlu0 %v705_v3, %s703_s24  ;;  %674 = vrot.lane.b32.xlu1 %v673_v2, %s706_s26 }
  0x18   : > { %325 = vrot.lane.b32.xlu2 %v705_v3, %s704_s25 }
  0x1f   : > { %358 = vrot.lane.b32.xlu0 %v759_v1, %s706_s26  ;;  %310 = vrot.lane.b32.xlu1 %v757_v0, %s707_s27 }
  0x20   : > { %312 = vrot.lane.b32.xlu2 %v705_v3, %s707_s27 }
  0x27   : > { %321 = vrot.lane.b32.xlu0 %v759_v1, %s704_s25  ;;  %308 = vrot.lane.b32.xlu1 %v759_v1, %s707_s27 }
  0x28   : > { %297 = vrot.lane.b32.xlu2 %v759_v1, %s708_s28 }
  0x2f   : > { %299 = vrot.lane.b32.xlu0 %v757_v0, %s708_s28  ;;  %284 = vrot.lane.b32.xlu1 %v759_v1, %s709_s29 }
  0x30   : > { %286 = vrot.lane.b32.xlu2 %v757_v0, %s709_s29 }
  0x37   : > { %295 = vrot.lane.b32.xlu0 %v705_v3, %s708_s28  ;;  %282 = vrot.lane.b32.xlu1 %v705_v3, %s709_s29 }
  0x38   : > { %679 = vrot.lane.b32.xlu2 %v678_v4, %s710_s30  ;;  %v501_v4 = vld [vmem:[%s974_s4] sm:$0xf] }
  0x3f   : > { %267 = vrot.lane.b32.xlu0 %v759_v1, %s711_s6  ;;  %269 = vrot.lane.b32.xlu1 %v757_v0, %s711_s6 }
  0x40   : > { %347 = vrot.lane.b32.xlu2 %v705_v3, %s710_s30 }
  0x47   : > { %265 = vrot.lane.b32.xlu0 %v705_v3, %s711_s6  ;;  %373 = vperm.xlu1 %683, %v370_v37  }
  0x6a   : > { %v324_v5 = vpop.permute.xlu2 %323 }
  0x72   : > { %v799_v8 = vpop.permute.xlu2 %325 }
  0x73   : > { %v329_v26 = vsel %vm327_vm4, %v324_v5, %v799_v8 }
  0x7a   : > { %v805_v12 = vpop.permute.xlu2 %312 }
  0x81   : > { %v337_v13 = vpop.permute.xlu0 %336  ;;  %v335_v14 = vpop.permute.xlu1 %334 }
  0x82   : > { %v341_v15 = vsel %vm340_vm0, %v335_v14, %v337_v13  ;;  %v298_v23 = vpop.permute.xlu2 %297 }
  0x83   : > { %623 = vmatpush.msk.msra.mxu0 %vm801_vm1, %v341_v15 }
  0x89   : > { %v814_v18 = vpop.permute.xlu0 %338  ;;  %v816_v19 = vpop.permute.xlu1 %674 }
  0x8a   : > { %v677_v20 = vunpack.i.h.bf16 %v816_v19  ;;  %v676_v21 = vunpack.i.l.bf16 %v816_v19  ;;  %v342_v22 = vsel %vm340_vm0, %v337_v13, %v814_v18  ;;  %v287_v31 = vpop.permute.xlu2 %286 }
  0x8b   : > { %630 = vmatpush.msk.msra.mxu1 %vm810_vm2, %v342_v22 }
  0x8c   : > { %v366_v24 = vsel %vm364_vm3, %v676_v21, %v677_v20 }
  0x8d   : > { %408 = vmatpush.msra.mxu1 %v366_v24 }
  0x8f   : > { %631 = vmatpush.msk.msra.mxu1 %vm827_vm5, %v329_v26 }
  0x91   : > { %v359_v27 = vpop.permute.xlu0 %358  ;;  %v311_v28 = vpop.permute.xlu1 %310 }
  0x92   : > { %v365_v29 = vsel %vm364_vm3, %v359_v27, %v676_v21  ;;  %v316_v30 = vsel %vm314_vm6, %v311_v28, %v805_v12  ;;  %v680_v39 = vpop.permute.xlu2 %679 }
  0x93   : > { %388 = vmatpush.msra.mxu0 %v365_v29  ;;  %632 = vmatpush.msk.msra.mxu1 %vm810_vm2, %v316_v30  ;;  %v682_v40 = vunpack.i.h.bf16 %v680_v39  ;;  %v681_v41 = vunpack.i.l.bf16 %v680_v39 }
  0x95   : > { %411 = vmatpush.msra.mxu1 %v757_v0  ;;  %v355_v46 = vsel %vm353_vm10, %v681_v41, %v682_v40 }
  0x99   : > { %v322_v33 = vpop.permute.xlu0 %321  ;;  %v309_v34 = vpop.permute.xlu1 %308 }
  0x9a   : > { %v328_v35 = vsel %vm327_vm4, %v322_v33, %v324_v5  ;;  %v315_v36 = vsel %vm314_vm6, %v309_v34, %v311_v28  ;;  %v862_v47 = vpop.permute.xlu2 %347 }
  0x9b   : > { %624 = vmatpush.msk.msra.mxu0 %vm841_vm7, %v328_v35  ;;  %v354_v52 = vsel %vm353_vm10, %v862_v47, %v681_v41 }
  0x9d   : > { %625 = vmatpush.msk.msra.mxu0 %vm801_vm1, %v315_v36 }
  0x9f   : > { %391 = vmatpush.msra.mxu0 %v759_v1 }
  0xa1   : > { %v300_v42 = vpop.permute.xlu0 %299  ;;  %v285_v43 = vpop.permute.xlu1 %284 }
  0xa2   : > { %v303_v44 = vsel %vm301_vm8, %v298_v23, %v300_v42  ;;  %v290_v45 = vsel %vm288_vm9, %v285_v43, %v287_v31 }
  0xa3   : > { %633 = vmatpush.msk.msra.mxu1 %vm827_vm5, %v303_v44 }
  0xa5   : > { %634 = vmatpush.msk.msra.mxu1 %vm810_vm2, %v290_v45 }
  0xa7   : > { %414 = vmatpush.msra.mxu1 %v355_v46 }
  0xa9   : > { %v864_v48 = vpop.permute.xlu0 %295  ;;  %v866_v49 = vpop.permute.xlu1 %282 }
  0xaa   : > { %v302_v50 = vsel %vm301_vm8, %v864_v48, %v298_v23  ;;  %v289_v51 = vsel %vm288_vm9, %v866_v49, %v285_v43 }
  0xab   : > { %626 = vmatpush.msk.msra.mxu0 %vm841_vm7, %v302_v50 }
  0xad   : > { %627 = vmatpush.msk.msra.mxu0 %vm801_vm1, %v289_v51 }
  0xaf   : > { %394 = vmatpush.msra.mxu0 %v354_v52 }
  0xb1   : > { %v268_v53 = vpop.permute.xlu0 %267  ;;  %v270_v54 = vpop.permute.xlu1 %269 }
  0xb2   : > { %v273_v56 = vsel %vm271_vm11, %v268_v53, %v270_v54 }
  0xb3   : > { %635 = vmatpush.msk.msra.mxu1 %vm827_vm5, %v273_v56 }
  0xb4   : > { %636 = vmatmul.msk.f32.vlgmr.msra.gmra.mxu1 %vm376_vm12, %v369_v55 }
  0xb9   : > { %v885_v57 = vpop.permute.xlu0 %265  ;;  %v374_v59 = vpop.permute.xlu1 %373 }
  0xba   : > { %v272_v58 = vsel %vm271_vm11, %v885_v57, %v268_v53 }
  0xbb   : > { %628 = vmatpush.msk.msra.mxu0 %vm841_vm7, %v272_v58 }
  0xbc   : > { %629 = vmatmul.msk.f32.vlgmr.msra.gmra.mxu0 %vm376_vm12, %v369_v55 }
 0x131   : > { %v417_v60 = vpop.f32.mrf.mxu1 }
 0x132   : > { %v418_v61 = vadd.f32 %v417_v60, %v374_v59 }
 0x134   : > { %v421_v62 = vmax.f32 %v418_v61, 0.0 }
 0x136   : > { %476 = vrot.lane.b32.xlu2 %v421_v62, %s703_s24 }
 0x139   : > { %v397_v63 = vpop.f32.mrf.mxu0 }
 0x13a   : > { %v398_v0 = vadd.f32 %v397_v63, %v374_v59 }
 0x13c   : > { %v420_v1 = vmax.f32 %v398_v0, 0.0 }
 0x13e   : > { %466 = vrot.lane.b32.xlu2 %v421_v62, %s704_s25  ;;  %474 = vrot.lane.b32.xlu0 %v420_v1, %s703_s24  ;;  %v684_v2 = vpack.i.bf16 %v420_v1, %v421_v62  ;;  %v689_v3 = vpack.i.bf16 %v421_v62, %v420_v1 }
 0x140   : > { %685 = vrot.lane.b32.xlu1 %v684_v2, %s706_s26 }
 0x146   : > { %454 = vrot.lane.b32.xlu2 %v420_v1, %s707_s27  ;;  %456 = vrot.lane.b32.xlu0 %v421_v62, %s707_s27 }
 0x148   : > { %464 = vrot.lane.b32.xlu1 %v420_v1, %s704_s25 }
 0x14e   : > { %434 = vrot.lane.b32.xlu2 %v420_v1, %s709_s29  ;;  %444 = vrot.lane.b32.xlu0 %v420_v1, %s708_s28 }
 0x150   : > { %446 = vrot.lane.b32.xlu1 %v421_v62, %s708_s28 }
 0x156   : > { %424 = vrot.lane.b32.xlu2 %v420_v1, %s711_s6  ;;  %436 = vrot.lane.b32.xlu0 %v421_v62, %s709_s29 }
 0x158   : > { %690 = vrot.lane.b32.xlu1 %v689_v3, %s710_s30 }
 0x15e   : > { %426 = vrot.lane.b32.xlu0 %v421_v62, %s711_s6 }
 0x160   : > { %504 = vperm.xlu1 %683, %v501_v4  }
 0x190   : > { %v477_v5 = vpop.permute.xlu2 %476 }
 0x191   : > { %v479_v6 = vsel %vm340_vm0, %v477_v5, %v814_v18 }
 0x192   : > { %644 = vmatpush.msk.msra.mxu3 %vm810_vm2, %v479_v6 }
 0x198   : > { %v467_v7 = vpop.permute.xlu2 %466 }
 0x199   : > { %v469_v22 = vsel %vm327_vm4, %v467_v7, %v799_v8 }
 0x1a0   : > { %v455_v18 = vpop.permute.xlu2 %454 }
 0x1a8   : > { %v435_v8 = vpop.permute.xlu2 %434 }
 0x1a9   : > { %v438_v29 = vsel %vm288_vm9, %v866_v49, %v435_v8 }
 0x1b0   : > { %v475_v9 = vpop.permute.xlu0 %474  ;;  %v425_v37 = vpop.permute.xlu2 %424 }
 0x1b1   : > { %v478_v11 = vsel %vm340_vm0, %v475_v9, %v477_v5  ;;  %v428_v40 = vsel %vm271_vm11, %v885_v57, %v425_v37 }
 0x1b2   : > { %v686_v13 = vpop.permute.xlu1 %685  ;;  %637 = vmatpush.msk.msra.mxu2 %vm801_vm1, %v478_v11 }
 0x1b3   : > { %v688_v14 = vunpack.i.h.bf16 %v686_v13  ;;  %v687_v15 = vunpack.i.l.bf16 %v686_v13 }
 0x1b5   : > { %v496_v16 = vsel %vm364_vm3, %v688_v14, %v687_v15  ;;  %v497_v21 = vsel %vm364_vm3, %v687_v15, %v677_v20 }
 0x1b6   : > { %518 = vmatpush.msra.mxu2 %v496_v16  ;;  %538 = vmatpush.msra.mxu3 %v497_v21 }
 0x1b8   : > { %645 = vmatpush.msk.msra.mxu3 %vm827_vm5, %v469_v22  ;;  %v457_v23 = vpop.permute.xlu0 %456 }
 0x1b9   : > { %v459_v24 = vsel %vm314_vm6, %v457_v23, %v805_v12  ;;  %v458_v20 = vsel %vm314_vm6, %v455_v18, %v457_v23 }
 0x1ba   : > { %v465_v26 = vpop.permute.xlu1 %464  ;;  %646 = vmatpush.msk.msra.mxu3 %vm810_vm2, %v459_v24 }
 0x1bb   : > { %v468_v19 = vsel %vm327_vm4, %v465_v26, %v467_v7 }
 0x1bc   : > { %638 = vmatpush.msk.msra.mxu2 %vm841_vm7, %v468_v19  ;;  %541 = vmatpush.msra.mxu3 %v421_v62 }
 0x1be   : > { %639 = vmatpush.msk.msra.mxu2 %vm801_vm1, %v458_v20 }
 0x1c0   : > { %521 = vmatpush.msra.mxu2 %v420_v1  ;;  %v445_v27 = vpop.permute.xlu0 %444 }
 0x1c1   : > { %v448_v12 = vsel %vm301_vm8, %v864_v48, %v445_v27 }
 0x1c2   : > { %v447_v28 = vpop.permute.xlu1 %446  ;;  %640 = vmatpush.msk.msra.mxu2 %vm841_vm7, %v448_v12 }
 0x1c3   : > { %v449_v30 = vsel %vm301_vm8, %v445_v27, %v447_v28 }
 0x1c4   : > { %641 = vmatpush.msk.msra.mxu2 %vm801_vm1, %v438_v29  ;;  %647 = vmatpush.msk.msra.mxu3 %vm827_vm5, %v449_v30 }
 0x1c8   : > { %v437_v31 = vpop.permute.xlu0 %436 }
 0x1c9   : > { %v439_v33 = vsel %vm288_vm9, %v435_v8, %v437_v31 }
 0x1ca   : > { %v691_v34 = vpop.permute.xlu1 %690  ;;  %648 = vmatpush.msk.msra.mxu3 %vm810_vm2, %v439_v33 }
 0x1cb   : > { %v693_v35 = vunpack.i.h.bf16 %v691_v34  ;;  %v692_v36 = vunpack.i.l.bf16 %v691_v34 }
 0x1cd   : > { %v488_v38 = vsel %vm353_vm10, %v862_v47, %v692_v36  ;;  %v489_v39 = vsel %vm353_vm10, %v692_v36, %v693_v35 }
 0x1ce   : > { %524 = vmatpush.msra.mxu2 %v488_v38  ;;  %544 = vmatpush.msra.mxu3 %v489_v39 }
 0x1d0   : > { %642 = vmatpush.msk.msra.mxu2 %vm841_vm7, %v428_v40  ;;  %v427_v17 = vpop.permute.xlu0 %426 }
 0x1d1   : > { %643 = vmatmul.msk.f32.vlgmr.msra.gmra.mxu2 %vm376_vm12, %v500_v10  ;;  %v429_v41 = vsel %vm271_vm11, %v425_v37, %v427_v17 }
 0x1d2   : > { %649 = vmatpush.msk.msra.mxu3 %vm827_vm5, %v429_v41  ;;  %v505_v43 = vpop.permute.xlu1 %504 }
 0x1d3   : > { %650 = vmatmul.msk.f32.vlgmr.msra.gmra.mxu3 %vm376_vm12, %v500_v10 }
 0x254   : > { %v527_v42 = vpop.f32.mrf.mxu2 }
 0x255   : > { %v528_v45 = vadd.f32 %v527_v42, %v505_v43 }
 0x256   : > { %v547_v44 = vpop.f32.mrf.mxu3 }
 0x257   : > { %v548_v46 = vadd.f32 %v547_v44, %v505_v43  ;;  %v550_v32 = vmax.f32 %v528_v45, 0.0 }
 0x259   : > { %v551_v47 = vmax.f32 %v548_v46, 0.0 }
 0x25b   : > { %v554_v48 = vrot.slane %v551_v47, 4 }
 0x25d   : > { %v556_v49 = vsel %vm555_vm13, %v550_v32, %v554_v48 }
 0x25e   : > { %558 = vst [vmem:[%s224_s20] sm:$0xff] %v556_v49 }
 0x25f PF: > { %s15_s18 = sadd.s32 1, %s701_s18  }
 0x260   : > { %p12_p4 = scmp.ge.s32.totalorder %s15_s18, 4  }
 0x262   :  { %14 = sbr.rel (!%p12_p4) target bundleno = 1 (0x1), region = 70 }

</bundles_post_ra>
